<compile_context>
chip_gen: v7x
topology: tpu7x:2x2x1
jax: 0.10.0
libtpu: 0.0.40
codegen_flags: <defaults>
</compile_context>

<pallas_src>
import jax
import jax.numpy as jnp
from jax import lax
from jax.experimental import pallas as pl
from jax.experimental.pallas import tpu as pltpu


MARGIN = 0.3


def _triplet_kernel(x_ref, trow_ref, loss_ref, correct_ref):
    x = x_ref[...].astype(jnp.float32)                       # (n, d)
    n = x.shape[0]

    # ||xi||^2 + ||xj||^2 - 2 xi.xj   (MXU matmul for the Gram matrix)
    sq = jnp.sum(x * x, axis=1, keepdims=True)                # (n, 1)
    gram = lax.dot_general(
        x, x,
        dimension_numbers=(((1,), (1,)), ((), ())),
        preferred_element_type=jnp.float32)                   # (n, n)
    dist2 = sq + jnp.transpose(sq) - 2.0 * gram               # (n, n) squared dists

    # same-label mask, rebuilt from a single (1, n) label row (XLU transpose
    # co-issues with the VPU work; saves one input DMA).
    t_row = trow_ref[...]                                      # (1, n) f32 labels
    mask = jnp.transpose(t_row) == t_row                       # (n, n) bool

    # Hard positive / negative mining per row on SQUARED distances
    # (clamp + sqrt are monotone, so winners are identical; sqrt deferred
    # to the 2n selected values instead of n^2).
    neg_inf = jnp.float32(-jnp.inf)
    pos_inf = jnp.float32(jnp.inf)
    dist_ap2 = jnp.max(jnp.where(mask, dist2, neg_inf), axis=1, keepdims=True)  # (n,1)
    dist_an2 = jnp.min(jnp.where(mask, pos_inf, dist2), axis=1, keepdims=True)  # (n,1)

    dist_ap = jnp.sqrt(jnp.maximum(dist_ap2, 1e-12))           # (n, 1)
    dist_an = jnp.sqrt(jnp.maximum(dist_an2, 1e-12))           # (n, 1)

    # MarginRankingLoss(y=1): mean(max(0, -(dist_an - dist_ap) + margin))
    per_sample = jnp.maximum(dist_ap - dist_an + jnp.float32(MARGIN), 0.0)      # (n,1)
    loss_ref[0, 0] = jnp.sum(per_sample) / jnp.float32(n)

    # correct = sum(dist_an >= dist_ap)
    correct_ref[0, 0] = jnp.sum((dist_an >= dist_ap).astype(jnp.int32))


def ori_triplet_loss(inputs, targets):
    """inputs: (n, d) float32 features, targets: (n,) integer labels.

    Returns (loss: f32 scalar, correct: i32 scalar, n: python int),
    matching the PyTorch module's (loss, correct, dist_an.shape[0]).
    """
    n, d = inputs.shape
    # Labels are small class indices -> exactly representable in f32; a float
    # row keeps the in-kernel transpose on the well-trodden f32 XLU path.
    t_row = targets.astype(jnp.float32).reshape(1, n)

    cost = pl.CostEstimate(
        flops=2 * n * n * d + 8 * n * n,
        transcendentals=2 * n,
        bytes_accessed=n * d * 4 + n * 4 + 8,
    )

    loss, correct = pl.pallas_call(
        _triplet_kernel,
        out_shape=(
            jax.ShapeDtypeStruct((1, 1), jnp.float32),
            jax.ShapeDtypeStruct((1, 1), jnp.int32),
        ),
        in_specs=[
            pl.BlockSpec((n, d), lambda: (0, 0)),
            pl.BlockSpec((1, n), lambda: (0, 0)),
        ],
        out_specs=(
            pl.BlockSpec(memory_space=pltpu.SMEM),
            pl.BlockSpec(memory_space=pltpu.SMEM),
        ),
        cost_estimate=cost,
    )(inputs, t_row)

    return loss[0, 0], correct[0, 0], n


def _reference(inputs, targets, margin=MARGIN):
    """Pure-JAX reference mirroring the PyTorch forward."""
    sq = jnp.sum(inputs ** 2, axis=1, keepdims=True)
    dist = jnp.sqrt(jnp.maximum(sq + sq.T - 2.0 * inputs @ inputs.T, 1e-12))
    mask = targets[:, None] == targets[None, :]
    dist_ap = jnp.max(jnp.where(mask, dist, -jnp.inf), axis=1)
    dist_an = jnp.min(jnp.where(mask, jnp.inf, dist), axis=1)
    loss = jnp.mean(jnp.maximum(dist_ap - dist_an + margin, 0.0))
    correct = jnp.sum(dist_an >= dist_ap)
    return loss, correct


if __name__ == "__main__":
    key = jax.random.PRNGKey(0)
    batch, feat_dim = 8, 32
    inputs = jax.random.normal(key, (batch, feat_dim), dtype=jnp.float32)
    # 4 identities x 2 samples each (every anchor has a positive & negative)
    targets = jnp.array([0, 0, 1, 1, 2, 2, 3, 3], dtype=jnp.int32)

    loss, correct, count = ori_triplet_loss(inputs, targets)
    loss = jax.block_until_ready(loss)
    correct = jax.block_until_ready(correct)

    ref_loss, ref_correct = _reference(inputs, targets)
    assert jnp.allclose(loss, ref_loss, atol=1e-5), (loss, ref_loss)
    assert int(correct) == int(ref_correct), (correct, ref_correct)
    assert count == batch

    print("KERNEL_OK")
</pallas_src>

<mosaic_0001>
module attributes {stable_mosaic.version = 11 : i64} {
  func.func @_triplet_kernel(%arg0: memref<8x32xf32, #tpu.memory_space<vmem>>, %arg1: memref<1x8xf32, #tpu.memory_space<vmem>>, %arg2: memref<1x1xf32, #tpu.memory_space<smem>>, %arg3: memref<1x1xi32, #tpu.memory_space<smem>>) attributes {dimension_semantics = [], scalar_prefetch = 0 : i64, scratch_operands = 0 : i64, tpu.core_type = #tpu.core_type<tc>} {
    %c0 = arith.constant 0 : index
    %c0_0 = arith.constant 0 : index
    %0 = vector.load %arg0[%c0, %c0_0] : memref<8x32xf32, #tpu.memory_space<vmem>>, vector<8x32xf32>
    %1 = arith.mulf %0, %0 : vector<8x32xf32>
    %cst = arith.constant dense<0.000000e+00> : vector<8xf32>
    %2 = vector.multi_reduction <add>, %1, %cst [1] : vector<8x32xf32> to vector<8xf32>
    %3 = vector.shape_cast %2 : vector<8xf32> to vector<8x1xf32>
    %cst_1 = arith.constant dense<0.000000e+00> : vector<8x8xf32>
    %4 = tpu.matmul %0, %0, %cst_1 {dimension_numbers = #tpu.dot_dimension_numbers<[1], [1], [0], [0], [0, 0, 1, 0], [], []>} : vector<8x32xf32>, vector<8x32xf32>, vector<8x8xf32> -> vector<8x8xf32>
    %5 = tpu.transpose %3, [1, 0] : vector<8x1xf32> -> vector<1x8xf32>
    %6 = vector.broadcast %3 : vector<8x1xf32> to vector<8x8xf32>
    %7 = vector.broadcast %5 : vector<1x8xf32> to vector<8x8xf32>
    %8 = arith.addf %6, %7 : vector<8x8xf32>
    %cst_2 = arith.constant 2.000000e+00 : f32
    %9 = vector.broadcast %cst_2 : f32 to vector<8x8xf32>
    %10 = arith.mulf %9, %4 : vector<8x8xf32>
    %11 = arith.subf %8, %10 : vector<8x8xf32>
    %c0_3 = arith.constant 0 : index
    %c0_4 = arith.constant 0 : index
    %12 = vector.load %arg1[%c0_3, %c0_4] : memref<1x8xf32, #tpu.memory_space<vmem>>, vector<1x8xf32>
    %13 = tpu.transpose %12, [1, 0] : vector<1x8xf32> -> vector<8x1xf32>
    %14 = vector.broadcast %13 : vector<8x1xf32> to vector<8x8xf32>
    %15 = vector.broadcast %12 : vector<1x8xf32> to vector<8x8xf32>
    %16 = arith.cmpf oeq, %14, %15 : vector<8x8xf32>
    %cst_5 = arith.constant 0xFF800000 : f32
    %17 = vector.broadcast %cst_5 : f32 to vector<8x8xf32>
    %18 = arith.select %16, %11, %17 : vector<8x8xi1>, vector<8x8xf32>
    %cst_6 = arith.constant dense<0xFF800000> : vector<8xf32>
    %19 = vector.multi_reduction <maximumf>, %18, %cst_6 [1] : vector<8x8xf32> to vector<8xf32>
    %20 = vector.shape_cast %19 : vector<8xf32> to vector<8x1xf32>
    %cst_7 = arith.constant 0x7F800000 : f32
    %21 = vector.broadcast %cst_7 : f32 to vector<8x8xf32>
    %22 = arith.select %16, %21, %11 : vector<8x8xi1>, vector<8x8xf32>
    %cst_8 = arith.constant dense<0x7F800000> : vector<8xf32>
    %23 = vector.multi_reduction <minimumf>, %22, %cst_8 [1] : vector<8x8xf32> to vector<8xf32>
    %24 = vector.shape_cast %23 : vector<8xf32> to vector<8x1xf32>
    %cst_9 = arith.constant 9.99999996E-13 : f32
    %25 = vector.broadcast %cst_9 : f32 to vector<8x1xf32>
    %26 = arith.maximumf %20, %25 : vector<8x1xf32>
    %27 = math.sqrt %26 : vector<8x1xf32>
    %cst_10 = arith.constant 9.99999996E-13 : f32
    %28 = vector.broadcast %cst_10 : f32 to vector<8x1xf32>
    %29 = arith.maximumf %24, %28 : vector<8x1xf32>
    %30 = math.sqrt %29 : vector<8x1xf32>
    %31 = arith.subf %27, %30 : vector<8x1xf32>
    %cst_11 = arith.constant 3.000000e-01 : f32
    %32 = vector.broadcast %cst_11 : f32 to vector<8x1xf32>
    %33 = arith.addf %31, %32 : vector<8x1xf32>
    %cst_12 = arith.constant 0.000000e+00 : f32
    %34 = vector.broadcast %cst_12 : f32 to vector<8x1xf32>
    %35 = arith.maximumf %33, %34 : vector<8x1xf32>
    %36 = vector.shape_cast %35 : vector<8x1xf32> to vector<1x8x1xf32>
    %cst_13 = arith.constant dense<0.000000e+00> : vector<1xf32>
    %37 = vector.multi_reduction <add>, %36, %cst_13 [1, 2] : vector<1x8x1xf32> to vector<1xf32>
    %38 = vector.shape_cast %37 : vector<1xf32> to vector<1x1x1xf32>
    %39 = vector.extract %38[0, 0, 0] : f32 from vector<1x1x1xf32>
    %cst_14 = arith.constant 8.000000e+00 : f32
    %40 = arith.divf %39, %cst_14 : f32
    %c0_15 = arith.constant 0 : index
    %c0_16 = arith.constant 0 : index
    %41 = memref.load %arg2[%c0_15, %c0_16] : memref<1x1xf32, #tpu.memory_space<smem>>
    memref.store %40, %arg2[%c0_15, %c0_16] : memref<1x1xf32, #tpu.memory_space<smem>>
    %42 = arith.cmpf oge, %30, %27 : vector<8x1xf32>
    %43 = arith.extui %42 : vector<8x1xi1> to vector<8x1xi32>
    %44 = vector.shape_cast %43 : vector<8x1xi32> to vector<1x8x1xi32>
    %cst_17 = arith.constant dense<0> : vector<1xi32>
    %45 = vector.multi_reduction <add>, %44, %cst_17 [1, 2] : vector<1x8x1xi32> to vector<1xi32>
    %46 = vector.shape_cast %45 : vector<1xi32> to vector<1x1x1xi32>
    %47 = vector.extract %46[0, 0, 0] : i32 from vector<1x1x1xi32>
    %c0_18 = arith.constant 0 : index
    %c0_19 = arith.constant 0 : index
    %48 = memref.load %arg3[%c0_18, %c0_19] : memref<1x1xi32, #tpu.memory_space<smem>>
    memref.store %47, %arg3[%c0_18, %c0_19] : memref<1x1xi32, #tpu.memory_space<smem>>
    return
  }
}

</mosaic_0001>

<bundles_post_ra>
// kernel: tpu_custom_call.1
= control target key start
LH: loop header
LB: loop body
LE: loop exit
PB: predicated region body
PF: predicated region fallthrough
CT: control target
= control target key end

     0   :  { %9 = vsyncpa [#allocation3], 0  ;;  %s409_s0 = inlined_call_operand.hbm [shape: f32[8,32], index: 0, kind: input, shape index: {}]   ;;  %s410_s1 = inlined_call_operand.vmem [shape: f32[1,8], index: 1, kind: input, shape index: {}]   ;;  %s411_s2 = inlined_call_operand.hbm [shape: f32[1,1], index: 2, kind: output, shape index: {0}]   ;;  %s412_s3 = inlined_call_operand.hbm [shape: s32[1,1], index: 3, kind: output, shape index: {1}]  }
   0x1   :  { %10 = vsyncpa [#allocation4], 0 }
   0x2   :  { %11 = vsyncpa [#allocation7], 0  ;;  %s344_s12 = smov [#allocation2]   ;;  %s296_s16 = scalar_lea.hbm %s409_s0, 128 }
   0x3   :  { %s18_s13 = sshll.u32 %s344_s12, 4  ;;  %p297_p0 = scmp.ne.s32.totalorder %s409_s0, %s296_s16  ;;  %s19_s13 = int_to_ptr.vmem [resolvable:$true] %s18_s13 }
   0x4   :  { %p300_p1 = scmp.lt.u32.totalorder %s296_s16, %s409_s0 }
   0x6   :  { %p302_p2 = pnand %p300_p1, %p297_p0 }
   0x8   :  { %305 = shalt.err (!%p302_p2)
}
   0x9   :  { %s306_s21 = scalar_lea.vmem %s19_s13, 128  ;;  %p311_p4 = scmp.lt.s32.totalorder %s19_s13, %s19_s13 }
   0xa   :  { %p307_p3 = scmp.ne.s32.totalorder %s19_s13, %s306_s21  ;;  %p312_p5 = scmp.lt.s32.totalorder %s306_s21, %s306_s21 }
   0xc   :  { %p313_p6 = por %p312_p5, %p311_p4 }
   0xe   :  { %p314_p7 = pnand %p313_p6, %p307_p3 }
  0x10   :  { %317 = shalt.err (!%p314_p7)
}
  0x11   :  { %21 = dma.hbm_to_vmem [thread:$0]  %s409_s0, 128, %s19_s13, [#allocation3]  }
  0x12   :  { %338 = dma.done.wait [#allocation3], 128  }
  0x13   :  { %339 = vsyncadd [#allocation3], 4294967168  ;;  %v345_v0 = vmov 0.0   ;;  %vm346_vm0 = vmmov 0   ;;  %v27_v1 = vld [vmem:[#allocation2] sm:$0xff]  ;;  %vm29_vm1 = vcmask 261120   ;;  %v138_v10 = vlaneseq }
  0x14   :  { %275 = vmatprep.subr.mxu0 %v345_v0  ;;  %277 = vmatprep.mubr.msk.f32.mxu0 %vm346_vm0, %v345_v0  ;;  %v28_v2 = vmul.f32 %v27_v1, %v27_v1  ;;  %v347_v4 = vmov 0   ;;  %v145_v5 = vld [vmem:[%s410_s1] sm:$0x1]  ;;  %vm191_vm2 = vcmask 64512   ;;  %vm218_vm9 = vcmask 7168   ;;  %s318_s29 = scalar_lea.hbm %s411_s2, 16 }
  0x15   :  { %276 = vmatpush3.xpose.msk.msra.mxu0 %vm29_vm1, %v27_v1  ;;  %290 = vset.pattern.permute.xlu1 %v347_v4  ;;  %v139_v11 = vshrl.u32 %v138_v10, 7  ;;  %p319_p8 = scmp.ne.s32.totalorder %s411_s2, %s318_s29  ;;  %p322_p9 = scmp.lt.u32.totalorder %s318_s29, %s411_s2 }
  0x16   :  { %v30_v3 = vsel %vm29_vm1, %v28_v2, 0.0 }
  0x17   :  { %31 = vadd.xlane.f32.xlu0 %v30_v3  ;;  %v140_v13 = vsub.s32 0, %v139_v11  ;;  %p324_p10 = pnand %p322_p9, %p319_p8 }
  0x18   :  { %278 = vmatmul.mubr.msk.f32.vlgmr.msra.gmra.mrb[0].mxu0 %vm29_vm1, %v27_v1 }
  0x19   :  { %v187_v17 = vrot.slane %v145_v5, %v140_v13 }
  0x44   :  { %146 = vxpose.xlu0.b32.start.end [1/1] (short) (narrow) %v145_v5, 8 }
  0x6d   :  { %291 = vset.pattern.permute.xlu0 %v347_v4 }
  0xa4   :  { %v32_v6 = vpop.xlane.xlu0 %31 }
  0xc4   :  { %v162_v7 = vpop.trf.xlu0 }
  0xc5   :  { %180 = vperm.xlu1 %290, %v162_v7  }
  0xeb   :  { %v102_v8 = vpop.f32.mrb[0].mxu0 }
  0xec   :  { %v279_v9 = vpop.f32.mrb[1].mxu0  ;;  %v143_v16 = vmul.f32 2.0, %v102_v8 }
  0xee   :  { %106 = vxpose.xlu1.b32.start.end [1/1] (short) (narrow) %v32_v6, 8 }
 0x144   :  { %v181_v12 = vpop.permute.xlu1 %180 }
 0x145   :  { %vm189_vm3 = vcmp.eq.f32.partialorder %v181_v12, %v187_v17 }
 0x16e   :  { %v122_v14 = vpop.trf.xlu1 }
 0x16f   :  { %v141_v15 = vrot.slane %v122_v14, %v140_v13 }
 0x171   :  { %v142_v18 = vadd.f32 %v141_v15, %v32_v6 }
 0x173   :  { %v144_v19 = vsub.f32 %v142_v18, %v143_v16 }
 0x175   :  { %v195_v20 = vsel %vm189_vm3, inf, %v144_v19  ;;  %v190_v21 = vsel %vm189_vm3, %v144_v19, -inf }
 0x176   :  { %v196_v22 = vsel %vm191_vm2, %v195_v20, inf  ;;  %v192_v23 = vsel %vm191_vm2, %v190_v21, -inf }
 0x177   :  { %197 = vmin.xlane.f32.xlu0 %v196_v22  ;;  %193 = vmax.xlane.f32.xlu1 %v192_v23 }
 0x204   :  { %v198_v24 = vpop.xlane.xlu0 %197  ;;  %v194_v25 = vpop.xlane.xlu1 %193 }
 0x205   :  { %v207_v26 = vmax.f32 %v198_v24, 1e-12  ;;  %v199_v27 = vmax.f32 %v194_v25, 1e-12 }
 0x207   :  { %292 = vrsqrt.f32 %v207_v26  ;;  %vm210_vm4 = vcmp.eq.f32.partialorder %v207_v26, inf  ;;  %v213_v32 = vand.u32 2147483648, %v207_v26  ;;  %vm202_vm5 = vcmp.eq.f32.partialorder %v199_v27, inf }
 0x208   :  { %294 = vrsqrt.f32 %v199_v27  ;;  %v205_v33 = vand.u32 2147483648, %v199_v27  ;;  %vm212_vm6 = vcmp.eq.f32.partialorder %v207_v26, 0.0  ;;  %vm204_vm7 = vcmp.eq.f32.partialorder %v199_v27, 0.0 }
 0x211   :  { %v293_v28 = vpop.eup %292 }
 0x212   :  { %v295_v29 = vpop.eup %294  ;;  %v209_v30 = vmul.f32 %v293_v28, %v207_v26 }
 0x213   :  { %v201_v31 = vmul.f32 %v295_v29, %v199_v27 }
 0x214   :  { %v211_v34 = vsel %vm210_vm4, %v207_v26, %v209_v30 }
 0x215   :  { %v203_v35 = vsel %vm202_vm5, %v199_v27, %v201_v31  ;;  %v214_v36 = vsel %vm212_vm6, %v213_v32, %v211_v34 }
 0x216   :  { %v206_v37 = vsel %vm204_vm7, %v205_v33, %v203_v35 }
 0x217   :  { %v215_v38 = vsub.f32 %v206_v37, %v214_v36  ;;  %vm234_vm8 = vcmp.ge.f32.partialorder %v214_v36, %v206_v37 }
 0x218   :  { %v235_v42 = vsel %vm234_vm8, 1, %v347_v4 }
 0x219   :  { %v216_v39 = vadd.f32 0.3, %v215_v38  ;;  %v236_v43 = vrot.slane %v235_v42, 4 }
 0x21b   :  { %v217_v40 = vmax.f32 %v216_v39, 0.0  ;;  %v237_v44 = vadd.s32 %v236_v43, %v235_v42 }
 0x21d   :  { %v219_v41 = vsel %vm218_vm9, %v217_v40, 0.0  ;;  %v238_v46 = vrot.slane %v237_v44, 2 }
 0x21e   :  { %220 = vadd.xlane.f32.xlu1 %v219_v41 }
 0x21f   :  { %v239_v49 = vadd.s32 %v238_v46, %v237_v44 }
 0x221   :  { %v240_v52 = vrot.slane %v239_v49, 1 }
 0x223   :  { %v241_v55 = vadd.s32 %v240_v52, %v239_v49 }
 0x2ab   :  { %v221_v45 = vpop.xlane.xlu1 %220 }
 0x2ac   :  { %v222_v47 = vrot.slane %v221_v45, 4 }
 0x2ae   :  { %v223_v48 = vadd.f32 %v222_v47, %v221_v45 }
 0x2b0   :  { %v224_v50 = vrot.slane %v223_v48, 2 }
 0x2b2   :  { %v225_v51 = vadd.f32 %v224_v50, %v223_v48 }
 0x2b4   :  { %v226_v53 = vrot.slane %v225_v51, 1 }
 0x2b6   :  { %v227_v54 = vadd.f32 %v226_v53, %v225_v51 }
 0x2b8   :  { %280 = vpush %v227_v54 }
 0x2b9   :  { %282 = vpush %v241_v55 }
 0x2e9   :  { %s281_s0 = spop %280 }
 0x2ea   :  { %s231_s1 = smul.f32 0.125, %s281_s0  ;;  %s283_s26 = spop %282 }
 0x2eb   :  { %244 = sst [smem:[#allocation6]] %s283_s26 }
 0x2ec   :  { %233 = sst [smem:[#allocation5]] %s231_s1 }
 0x2ed   :  { %327 = shalt.err (!%p324_p10)
}
 0x2ee   :  { %s348_s7 = smov [#allocation5]   ;;  %s328_s12 = scalar_lea.hbm %s412_s3, 16 }
 0x2ef   :  { %252 = dma.smem_to_hbm %s348_s7, 16, %s411_s2, [#allocation4]  }
 0x2f0   :  { %p329_p11 = scmp.ne.s32.totalorder %s412_s3, %s328_s12  ;;  %p332_p12 = scmp.lt.u32.totalorder %s328_s12, %s412_s3 }
 0x2f2   :  { %p334_p13 = pnand %p332_p12, %p329_p11 }
 0x2f4   :  { %337 = shalt.err (!%p334_p13)
}
 0x2f5   :  { %s349_s17 = smov [#allocation6]  }
 0x2f6   :  { %260 = dma.smem_to_hbm %s349_s17, 16, %s412_s3, [#allocation7]  }
 0x2f7   :  { %340 = dma.done.wait [#allocation4], 16  }
 0x2f8   :  { %341 = vsyncadd [#allocation4], 4294967280 }
 0x2f9   :  { %342 = dma.done.wait [#allocation7], 16  }
 0x2fa   :  { %343 = vsyncadd [#allocation7], 4294967280 }
 0x2fb   :  { %267 = sfence }
 0x2fc   :  { %268 = vsyncpa [#allocation3], 1 }
 0x2fd   :  { %269 = vsyncpa [#allocation4], 1 }
 0x2fe   :  { %270 = vsyncpa [#allocation7], 1 }

</bundles_post_ra>
